<compile_context>
chip_gen: v7x
topology: tpu7x:2x2x1
jax: 0.10.0
libtpu: 0.0.40
codegen_flags: <defaults>
</compile_context>

<pallas_src>
import math

import jax
import jax.numpy as jnp
from jax.experimental import pallas as pl
from jax.experimental.pallas import tpu as pltpu


# ----------------------------------------------------------------------------
# Pallas kernel: whole forward pass (single grid point, everything VMEM-resident)
# ----------------------------------------------------------------------------
def custom_network_kernel(x_ref, slab_ref, w2_ref, out_ref):
    # x_ref   : (Np, 8)   f32 VMEM - sample n in row n, x values in lanes 0:5, rest 0
    # slab_ref: (16, 128) f32 VMEM - constant parameter slab:
    #     rows 0:5  W_fused  (fused conv1 . conv2 . flatten . layer1 weight; x -> l1 preact)
    #     row  8    b_fused  (fused bias)
    #     row  9    layer2 bias
    #     row 10    layer3 weight row
    #     row 11    layer3 bias at lane 0, zeros elsewhere
    # w2_ref  : (128,128)  f32 VMEM - layer2 weight, transposed (in-features on rows)
    # out_ref : (Np, 1)    f32 VMEM

    # Fused first stage on the VPU: y1 = tanh(x @ W_fused + b_fused)
    # done as 5 rank-1 broadcast FMAs (no MXU pass, no lane-repeat prep of x).
    acc = x_ref[:, 0:1] * slab_ref[0:1, :]
    for i in range(1, 5):                                   # static unroll (traced once)
        acc = acc + x_ref[:, i:i + 1] * slab_ref[i:i + 1, :]
    y1 = jnp.tanh(acc + slab_ref[8:9, :])                   # (Np, 128)

    # layer2 + tanh: the single MXU matmul on the critical path.
    y2 = jnp.tanh(jnp.dot(y1, w2_ref[...],
                          preferred_element_type=jnp.float32)
                  + slab_ref[9:10, :])                       # (Np, 128)

    # layer3 (out dim 1): VPU multiply + lane reduction; bias folded into lane 0 of the
    # reduction input so the epilogue stays lane-dense.
    out_ref[...] = jnp.sum(y2 * slab_ref[10:11, :] + slab_ref[11:12, :],
                           axis=-1, keepdims=True)           # (Np, 1)


# ----------------------------------------------------------------------------
# One-time parameter repacking (all algebraic fusion hoisted out of the per-call path)
# ----------------------------------------------------------------------------
def prepare_params(params):
    c1w = params["conv1_w"].astype(jnp.float32)   # (3, 1, 2)
    c1b = params["conv1_b"].astype(jnp.float32)   # (3,)
    c2w = params["conv2_w"].astype(jnp.float32)   # (24, 3, 2)
    c2b = params["conv2_b"].astype(jnp.float32)   # (24,)
    l1w = params["l1_w"].astype(jnp.float32)      # (128, 72)
    l1b = params["l1_b"].astype(jnp.float32)      # (128,)
    l2w = params["l2_w"].astype(jnp.float32)      # (128, 128)
    l2b = params["l2_b"].astype(jnp.float32)      # (128,)
    l3w = params["l3_w"].astype(jnp.float32)      # (1, 128)
    l3b = params["l3_b"].astype(jnp.float32)      # (1,)

    # The pre-tanh part of the network (conv1 -> conv2 -> channel-major flatten -> layer1)
    # is affine in the 5 input values; extract it exactly as x @ W_fused + b_fused.
    def l1_preact(xf):                                        # (5,) -> (128,)
        patches1 = jnp.stack([xf[0:4], xf[1:5]], axis=0)      # (2, 4)
        h1 = c1w[:, 0, :] @ patches1 + c1b[:, None]           # (3, 4)
        h2 = (c2w[:, :, 0] @ h1[:, 0:3]
              + c2w[:, :, 1] @ h1[:, 1:4]
              + c2b[:, None])                                 # (24, 3)
        flat = h2.reshape(72)                                 # channel-major flatten
        return flat @ l1w.T + l1b                             # (128,)

    b_fused = l1_preact(jnp.zeros((5,), jnp.float32))                         # (128,)
    w_fused = jax.vmap(l1_preact)(jnp.eye(5, dtype=jnp.float32)) - b_fused    # (5, 128)

    slab = jnp.zeros((16, 128), jnp.float32)
    slab = slab.at[0:5, :].set(w_fused)
    slab = slab.at[8, :].set(b_fused)
    slab = slab.at[9, :].set(l2b)
    slab = slab.at[10, :].set(l3w[0, :])
    slab = slab.at[11, 0].set(l3b[0])

    # Total constant weight traffic per launch: 8 KiB slab + 64 KiB layer2 = 72 KiB f32.
    return {"slab": slab, "w2t": l2w.T}


# ----------------------------------------------------------------------------
# Wrappers: single-sample (module semantics) and batched (launch/DMA amortization)
# ----------------------------------------------------------------------------
def _forward_padded(x_pad, slab, w2t):
    n_pad = x_pad.shape[0]
    vmem = pl.BlockSpec(memory_space=pltpu.MemorySpace.VMEM)
    return pl.pallas_call(
        custom_network_kernel,
        out_shape=jax.ShapeDtypeStruct((n_pad, 1), jnp.float32),
        in_specs=[vmem, vmem, vmem],
        out_specs=vmem,
    )(x_pad, slab, w2t)


@jax.jit
def custom_network_forward(x, prepared):
    # Module semantics: input reshaped to a single (1,1,5) sample -> (1,1) output.
    xf = x.reshape(1, 5).astype(jnp.float32)
    x_pad = jnp.zeros((8, 8), jnp.float32).at[0:1, 0:5].set(xf)
    out = _forward_padded(x_pad, prepared["slab"], prepared["w2t"])
    return out[0:1, :]


@jax.jit
def custom_network_forward_batch(xs, prepared):
    # Amortized variant: N independent samples, ONE launch, ONE weight DMA.
    n = xs.shape[0]
    n_pad = max(8, -(-n // 8) * 8)
    x_pad = jnp.zeros((n_pad, 8), jnp.float32).at[:n, 0:5].set(
        xs.reshape(n, 5).astype(jnp.float32))
    out = _forward_padded(x_pad, prepared["slab"], prepared["w2t"])
    return out[:n, :]


# ----------------------------------------------------------------------------
# Deterministic parameter init (PyTorch-style uniform bounds) + pure-JAX reference
# ----------------------------------------------------------------------------
def init_params(key):
    def uniform(key, shape, fan_in):
        bound = 1.0 / math.sqrt(fan_in)
        return jax.random.uniform(key, shape, jnp.float32, -bound, bound)

    ks = jax.random.split(key, 10)
    return {
        "conv1_w": uniform(ks[0], (3, 1, 2), 1 * 2),
        "conv1_b": uniform(ks[1], (3,), 1 * 2),
        "conv2_w": uniform(ks[2], (24, 3, 2), 3 * 2),
        "conv2_b": uniform(ks[3], (24,), 3 * 2),
        "l1_w": uniform(ks[4], (128, 72), 72),
        "l1_b": uniform(ks[5], (128,), 72),
        "l2_w": uniform(ks[6], (128, 128), 128),
        "l2_b": uniform(ks[7], (128,), 128),
        "l3_w": uniform(ks[8], (1, 128), 128),
        "l3_b": uniform(ks[9], (1,), 128),
    }


def reference_forward(x, p):
    xf = x.reshape(5)
    patches1 = jnp.stack([xf[0:4], xf[1:5]], axis=0)                  # (2, 4)
    h1 = p["conv1_w"][:, 0, :] @ patches1 + p["conv1_b"][:, None]     # (3, 4)
    h2 = (p["conv2_w"][:, :, 0] @ h1[:, 0:3]
          + p["conv2_w"][:, :, 1] @ h1[:, 1:4]
          + p["conv2_b"][:, None])                                    # (24, 3)
    flat = h2.reshape(1, 72)                                          # channel-major
    y1 = jnp.tanh(flat @ p["l1_w"].T + p["l1_b"])
    y2 = jnp.tanh(y1 @ p["l2_w"].T + p["l2_b"])
    return y2 @ p["l3_w"].T + p["l3_b"]                               # (1, 1)


if __name__ == "__main__":
    key = jax.random.PRNGKey(0)
    k_params, k_x, k_xb = jax.random.split(key, 3)
    params = init_params(k_params)
    prepared = prepare_params(params)

    # Single-sample forward (module semantics: forward reshapes input to (1,1,5)).
    x = jax.random.normal(k_x, (1, 5), jnp.float32)
    out = jax.block_until_ready(custom_network_forward(x, prepared))
    ref = reference_forward(x, params)
    assert out.shape == (1, 1)
    assert jnp.allclose(out, ref, atol=1e-4, rtol=1e-4), (out, ref)

    # Amortized batched forward: 16 independent samples in one launch / one weight DMA.
    xb = jax.random.normal(k_xb, (16, 5), jnp.float32)
    outb = jax.block_until_ready(custom_network_forward_batch(xb, prepared))
    refb = jax.vmap(lambda xi: reference_forward(xi, params)[0, 0])(xb)[:, None]
    assert outb.shape == (16, 1)
    assert jnp.allclose(outb, refb, atol=1e-4, rtol=1e-4), (outb, refb)

    print("KERNEL_OK")
</pallas_src>

<mosaic_0001>
module attributes {stable_mosaic.version = 11 : i64} {
  func.func @custom_network_kernel(%arg0: memref<8x8xf32, #tpu.memory_space<vmem>>, %arg1: memref<16x128xf32, #tpu.memory_space<vmem>>, %arg2: memref<128x128xf32, #tpu.memory_space<vmem>>, %arg3: memref<8x1xf32, #tpu.memory_space<vmem>>) attributes {dimension_semantics = [], scalar_prefetch = 0 : i64, scratch_operands = 0 : i64, tpu.core_type = #tpu.core_type<tc>} {
    %c0 = arith.constant 0 : index
    %c0_0 = arith.constant 0 : index
    %0 = vector.load %arg0[%c0, %c0_0] : memref<8x8xf32, #tpu.memory_space<vmem>>, vector<8x1xf32>
    %c0_1 = arith.constant 0 : index
    %c0_2 = arith.constant 0 : index
    %1 = vector.load %arg1[%c0_1, %c0_2] : memref<16x128xf32, #tpu.memory_space<vmem>>, vector<1x128xf32>
    %2 = vector.broadcast %0 : vector<8x1xf32> to vector<8x128xf32>
    %3 = vector.broadcast %1 : vector<1x128xf32> to vector<8x128xf32>
    %4 = arith.mulf %2, %3 : vector<8x128xf32>
    %c0_3 = arith.constant 0 : index
    %c1 = arith.constant 1 : index
    %5 = vector.load %arg0[%c0_3, %c1] : memref<8x8xf32, #tpu.memory_space<vmem>>, vector<8x1xf32>
    %c1_4 = arith.constant 1 : index
    %c0_5 = arith.constant 0 : index
    %6 = vector.load %arg1[%c1_4, %c0_5] : memref<16x128xf32, #tpu.memory_space<vmem>>, vector<1x128xf32>
    %7 = vector.broadcast %5 : vector<8x1xf32> to vector<8x128xf32>
    %8 = vector.broadcast %6 : vector<1x128xf32> to vector<8x128xf32>
    %9 = arith.mulf %7, %8 : vector<8x128xf32>
    %10 = arith.addf %4, %9 : vector<8x128xf32>
    %c0_6 = arith.constant 0 : index
    %c2 = arith.constant 2 : index
    %11 = vector.load %arg0[%c0_6, %c2] : memref<8x8xf32, #tpu.memory_space<vmem>>, vector<8x1xf32>
    %c2_7 = arith.constant 2 : index
    %c0_8 = arith.constant 0 : index
    %12 = vector.load %arg1[%c2_7, %c0_8] : memref<16x128xf32, #tpu.memory_space<vmem>>, vector<1x128xf32>
    %13 = vector.broadcast %11 : vector<8x1xf32> to vector<8x128xf32>
    %14 = vector.broadcast %12 : vector<1x128xf32> to vector<8x128xf32>
    %15 = arith.mulf %13, %14 : vector<8x128xf32>
    %16 = arith.addf %10, %15 : vector<8x128xf32>
    %c0_9 = arith.constant 0 : index
    %c3 = arith.constant 3 : index
    %17 = vector.load %arg0[%c0_9, %c3] : memref<8x8xf32, #tpu.memory_space<vmem>>, vector<8x1xf32>
    %c3_10 = arith.constant 3 : index
    %c0_11 = arith.constant 0 : index
    %18 = vector.load %arg1[%c3_10, %c0_11] : memref<16x128xf32, #tpu.memory_space<vmem>>, vector<1x128xf32>
    %19 = vector.broadcast %17 : vector<8x1xf32> to vector<8x128xf32>
    %20 = vector.broadcast %18 : vector<1x128xf32> to vector<8x128xf32>
    %21 = arith.mulf %19, %20 : vector<8x128xf32>
    %22 = arith.addf %16, %21 : vector<8x128xf32>
    %c0_12 = arith.constant 0 : index
    %c4 = arith.constant 4 : index
    %23 = vector.load %arg0[%c0_12, %c4] : memref<8x8xf32, #tpu.memory_space<vmem>>, vector<8x1xf32>
    %c4_13 = arith.constant 4 : index
    %c0_14 = arith.constant 0 : index
    %24 = vector.load %arg1[%c4_13, %c0_14] : memref<16x128xf32, #tpu.memory_space<vmem>>, vector<1x128xf32>
    %25 = vector.broadcast %23 : vector<8x1xf32> to vector<8x128xf32>
    %26 = vector.broadcast %24 : vector<1x128xf32> to vector<8x128xf32>
    %27 = arith.mulf %25, %26 : vector<8x128xf32>
    %28 = arith.addf %22, %27 : vector<8x128xf32>
    %c8 = arith.constant 8 : index
    %c0_15 = arith.constant 0 : index
    %29 = vector.load %arg1[%c8, %c0_15] : memref<16x128xf32, #tpu.memory_space<vmem>>, vector<1x128xf32>
    %30 = vector.broadcast %29 : vector<1x128xf32> to vector<8x128xf32>
    %31 = arith.addf %28, %30 : vector<8x128xf32>
    %32 = math.tanh %31 : vector<8x128xf32>
    %c0_16 = arith.constant 0 : index
    %c0_17 = arith.constant 0 : index
    %33 = vector.load %arg2[%c0_16, %c0_17] : memref<128x128xf32, #tpu.memory_space<vmem>>, vector<128x128xf32>
    %cst = arith.constant dense<0.000000e+00> : vector<8x128xf32>
    %34 = tpu.matmul %32, %33, %cst {dimension_numbers = #tpu.dot_dimension_numbers<[1], [0], [0], [1], [0, 0, 1, 1], [], []>} : vector<8x128xf32>, vector<128x128xf32>, vector<8x128xf32> -> vector<8x128xf32>
    %c9 = arith.constant 9 : index
    %c0_18 = arith.constant 0 : index
    %35 = vector.load %arg1[%c9, %c0_18] : memref<16x128xf32, #tpu.memory_space<vmem>>, vector<1x128xf32>
    %36 = vector.broadcast %35 : vector<1x128xf32> to vector<8x128xf32>
    %37 = arith.addf %34, %36 : vector<8x128xf32>
    %38 = math.tanh %37 : vector<8x128xf32>
    %c10 = arith.constant 10 : index
    %c0_19 = arith.constant 0 : index
    %39 = vector.load %arg1[%c10, %c0_19] : memref<16x128xf32, #tpu.memory_space<vmem>>, vector<1x128xf32>
    %40 = vector.broadcast %39 : vector<1x128xf32> to vector<8x128xf32>
    %41 = arith.mulf %38, %40 : vector<8x128xf32>
    %c11 = arith.constant 11 : index
    %c0_20 = arith.constant 0 : index
    %42 = vector.load %arg1[%c11, %c0_20] : memref<16x128xf32, #tpu.memory_space<vmem>>, vector<1x128xf32>
    %43 = vector.broadcast %42 : vector<1x128xf32> to vector<8x128xf32>
    %44 = arith.addf %41, %43 : vector<8x128xf32>
    %cst_21 = arith.constant dense<0.000000e+00> : vector<8xf32>
    %45 = vector.multi_reduction <add>, %44, %cst_21 [1] : vector<8x128xf32> to vector<8xf32>
    %46 = vector.shape_cast %45 : vector<8xf32> to vector<8x1xf32>
    %c0_22 = arith.constant 0 : index
    %c0_23 = arith.constant 0 : index
    %47 = vector.load %arg3[%c0_22, %c0_23] : memref<8x1xf32, #tpu.memory_space<vmem>>, vector<8x1xf32>
    tpu.vector_store %arg3[%c0_22, %c0_23], %46 {strides = array<i32>} : memref<8x1xf32, #tpu.memory_space<vmem>>, vector<8x1xf32>,
    return
  }
}

</mosaic_0001>

<bundles_post_ra>
// kernel: custom_network_forward.1
= control target key start
LH: loop header
LB: loop body
LE: loop exit
PB: predicated region body
PF: predicated region fallthrough
CT: control target
= control target key end

     0   :  { %8 = vsyncpa [#allocation3], 0  ;;  %s436_s0 = inlined_call_operand.vmem [shape: f32[8,8], index: 0, kind: input, shape index: {}]   ;;  %s437_s1 = inlined_call_operand.hbm [shape: f32[16,128], index: 1, kind: input, shape index: {}]   ;;  %s438_s2 = inlined_call_operand.hbm [shape: f32[128,128], index: 2, kind: input, shape index: {}]   ;;  %s439_s3 = inlined_call_operand.vmem [shape: f32[8,1], index: 3, kind: output, shape index: {}]  }
   0x1   :  { %9 = vsyncpa [#allocation5], 0  ;;  %s374_s12 = smov [#allocation2]   ;;  %s326_s16 = scalar_lea.hbm %s437_s1, 256 }
   0x2   :  { %s17_s13 = sshll.u32 %s374_s12, 4  ;;  %p327_p0 = scmp.ne.s32.totalorder %s437_s1, %s326_s16  ;;  %s18_s13 = int_to_ptr.vmem [resolvable:$true] %s17_s13 }
   0x3   :  { %p330_p1 = scmp.lt.u32.totalorder %s326_s16, %s437_s1 }
   0x5   :  { %p332_p2 = pnand %p330_p1, %p327_p0 }
   0x7   :  { %335 = shalt.err (!%p332_p2)
}
   0x8   :  { %s336_s21 = scalar_lea.vmem %s18_s13, 256  ;;  %p341_p4 = scmp.lt.s32.totalorder %s18_s13, %s18_s13 }
   0x9   :  { %p337_p3 = scmp.ne.s32.totalorder %s18_s13, %s336_s21  ;;  %p342_p5 = scmp.lt.s32.totalorder %s336_s21, %s336_s21 }
   0xb   :  { %p343_p6 = por %p342_p5, %p341_p4 }
   0xd   :  { %p344_p7 = pnand %p343_p6, %p337_p3 }
   0xf   :  { %347 = shalt.err (!%p344_p7)
}
  0x10   :  { %s375_s22 = smov 128   ;;  %s376_s23 = smov 8  }
  0x11   :  { %23 = dma.hbm_to_vmem [thread:$0]  %s437_s1, 256, %s18_s13, [#allocation3], %s375_s22, %s375_s22, %s376_s23  }
  0x12   :  { %s377_s26 = smov [#allocation4]   ;;  %s348_s30 = scalar_lea.hbm %s438_s2, 2048 }
  0x13   :  { %s29_s27 = sshll.u32 %s377_s26, 4  ;;  %p349_p8 = scmp.ne.s32.totalorder %s438_s2, %s348_s30  ;;  %s30_s27 = int_to_ptr.vmem [resolvable:$true] %s29_s27 }
  0x14   :  { %p352_p9 = scmp.lt.u32.totalorder %s348_s30, %s438_s2 }
  0x16   :  { %p354_p10 = pnand %p352_p9, %p349_p8 }
  0x18   :  { %357 = shalt.err (!%p354_p10)
}
  0x19   :  { %s358_s8 = scalar_lea.vmem %s30_s27, 2048  ;;  %p363_p12 = scmp.lt.s32.totalorder %s30_s27, %s30_s27 }
  0x1a   :  { %p359_p11 = scmp.ne.s32.totalorder %s30_s27, %s358_s8  ;;  %p364_p13 = scmp.lt.s32.totalorder %s358_s8, %s358_s8 }
  0x1c   :  { %p365_p0 = por %p364_p13, %p363_p12 }
  0x1e   :  { %p366_p1 = pnand %p365_p0, %p359_p11 }
  0x20   :  { %369 = shalt.err (!%p366_p1)
}
  0x21   :  { %35 = dma.hbm_to_vmem [thread:$0]  %s438_s2, 2048, %s30_s27, [#allocation5], %s375_s22, %s375_s22, %s376_s23  }
  0x22   :  { %370 = dma.done.wait [#allocation3], 256  }
  0x23   :  { %371 = vsyncadd [#allocation3], 4294967040 }
  0x24   :  { %372 = dma.done.wait [#allocation5], 2048  }
  0x25   :  { %373 = vsyncadd [#allocation5], 4294965248  ;;  %v378_v0 = vmov 0   ;;  %v379_v1 = vmov 2   ;;  %v380_v2 = vmov 0.0|0.0   ;;  %v42_v3 = vld [vmem:[%s436_s0] sm:$0xff] }
  0x26   :  { %316 = vset.pattern.permute.xlu0 %v378_v0  ;;  %318 = vset.pattern.permute.xlu1 %v379_v1  ;;  %v105_v4 = vld [vmem:[#allocation4] sm:$0xff]  ;;  %v106_v5 = vld [vmem:[#allocation4 + $0x8] sm:$0xff]  ;;  %v107_v7 = vld [vmem:[#allocation4 + $0x10] sm:$0xff]  ;;  %v381_v12 = vmov 1   ;;  %v382_v13 = vmov 3   ;;  %v383_v17 = vmov 4  }
  0x27   :  { %280 = vmatprep.subr.bf16.mxu0 %v380_v2  ;;  %46 = vperm.xlu0 %316, %v42_v3   ;;  %v281_v6 = vpack.c.bf16 %v106_v5, %v105_v4  ;;  %v108_v8 = vld [vmem:[#allocation4 + $0x18] sm:$0xff]  ;;  %v109_v10 = vld [vmem:[#allocation4 + $0x20] sm:$0xff]  ;;  %v110_v11 = vld [vmem:[#allocation4 + $0x28] sm:$0xff]  ;;  %vm384_vm0 = vmmov 0   ;;  %v385_v25 = vmov 0.0   ;;  %vm211_vm1 = vcmask 7168  }
  0x28   :  { %67 = vperm.xlu1 %318, %v42_v3   ;;  %v284_v9 = vpack.c.bf16 %v108_v8, %v107_v7  ;;  %v287_v14 = vpack.c.bf16 %v110_v11, %v109_v10  ;;  %v111_v15 = vld [vmem:[#allocation4 + $0x30] sm:$0xff]  ;;  %v112_v16 = vld [vmem:[#allocation4 + $0x38] sm:$0xff]  ;;  %v113_v19 = vld [vmem:[#allocation4 + $0x40] sm:$0xff]  ;;  %277 = vmatprep.mubr.msk.f32.mxu0 %vm384_vm0, %v385_v25 }
  0x29   :  { %282 = vmatpush3.bf16.msra.mxu0 %v281_v6  ;;  %v290_v18 = vpack.c.bf16 %v112_v16, %v111_v15  ;;  %v114_v20 = vld [vmem:[#allocation4 + $0x48] sm:$0xff]  ;;  %v115_v22 = vld [vmem:[#allocation4 + $0x50] sm:$0xff]  ;;  %v116_v23 = vld [vmem:[#allocation4 + $0x58] sm:$0xff] }
  0x2a   :  { %283 = vmatprep.subr.bf16.mxu0 %v380_v2  ;;  %v293_v21 = vpack.c.bf16 %v114_v20, %v113_v19  ;;  %v296_v24 = vpack.c.bf16 %v116_v23, %v115_v22  ;;  %v117_v26 = vld [vmem:[#allocation4 + $0x60] sm:$0xff]  ;;  %v118_v27 = vld [vmem:[#allocation4 + $0x68] sm:$0xff]  ;;  %v119_v29 = vld [vmem:[#allocation4 + $0x70] sm:$0xff] }
  0x2b   :  { %317 = vset.pattern.permute.xlu0 %v381_v12  ;;  %v299_v28 = vpack.c.bf16 %v118_v27, %v117_v26  ;;  %v120_v30 = vld [vmem:[#allocation4 + $0x78] sm:$0xff]  ;;  %v219_v34 = vld [vmem:[#allocation2] ss:$0 sm:$0xff]  ;;  %v220_v35 = vld [vmem:[#allocation2 + $0x1] ss:$0 sm:$0xff] }
  0x2c   :  { %319 = vset.pattern.permute.xlu1 %v382_v13  ;;  %56 = vperm.xlu0 %317, %v42_v3   ;;  %v302_v31 = vpack.c.bf16 %v120_v30, %v119_v29  ;;  %v221_v36 = vld [vmem:[#allocation2 + $0x2] ss:$0 sm:$0xff]  ;;  %v222_v41 = vld [vmem:[#allocation2 + $0x3] ss:$0 sm:$0xff]  ;;  %v223_v44 = vld [vmem:[#allocation2 + $0x4] ss:$0 sm:$0xff] }
  0x2d   :  { %78 = vperm.xlu1 %319, %v42_v3   ;;  %285 = vmatpush3.bf16.msra.mxu0 %v284_v9  ;;  %v224_v50 = vld [vmem:[#allocation2 + $0x8] ss:$0 sm:$0xff]  ;;  %v225_v54 = vld [vmem:[#allocation2 + $0x9] ss:$0 sm:$0xff]  ;;  %v226_v58 = vld [vmem:[#allocation2 + $0xa] ss:$0 sm:$0xff] }
  0x2e   :  { %286 = vmatprep.subr.bf16.mxu0 %v380_v2  ;;  %v227_v60 = vld [vmem:[#allocation2 + $0xb] ss:$0 sm:$0xff] }
  0x30   :  { %321 = vset.pattern.permute.xlu0 %v383_v17 }
  0x31   :  { %320 = vset.pattern.permute.xlu1 %v383_v17  ;;  %288 = vmatpush3.bf16.msra.mxu0 %v287_v14 }
  0x32   :  { %89 = vperm.xlu1 %320, %v42_v3   ;;  %289 = vmatprep.subr.bf16.mxu0 %v380_v2 }
  0x35   :  { %291 = vmatpush3.bf16.msra.mxu0 %v290_v18 }
  0x36   :  { %292 = vmatprep.subr.bf16.mxu0 %v380_v2 }
  0x39   :  { %294 = vmatpush3.bf16.msra.mxu0 %v293_v21 }
  0x3a   :  { %295 = vmatprep.subr.bf16.mxu0 %v380_v2 }
  0x3d   :  { %297 = vmatpush3.bf16.msra.mxu0 %v296_v24 }
  0x3e   :  { %298 = vmatprep.subr.bf16.mxu0 %v380_v2 }
  0x41   :  { %300 = vmatpush3.bf16.msra.mxu0 %v299_v28 }
  0x42   :  { %301 = vmatprep.subr.bf16.mxu0 %v380_v2 }
  0x45   :  { %303 = vmatpush3.bf16.msra.mxu0 %v302_v31 }
  0xa6   :  { %v47_v32 = vpop.permute.xlu0 %46 }
  0xa7   :  { %v68_v33 = vpop.permute.xlu1 %67  ;;  %v53_v39 = vmul.f32 %v219_v34, %v47_v32 }
  0xa8   :  { %v74_v42 = vmul.f32 %v221_v36, %v68_v33 }
  0xab   :  { %v57_v37 = vpop.permute.xlu0 %56 }
  0xac   :  { %v79_v38 = vpop.permute.xlu1 %78  ;;  %v63_v40 = vmul.f32 %v220_v35, %v57_v37 }
  0xad   :  { %v85_v46 = vmul.f32 %v222_v41, %v79_v38 }
  0xae   :  { %v64_v43 = vadd.f32 %v63_v40, %v53_v39 }
  0xb0   :  { %v75_v45 = vadd.f32 %v74_v42, %v64_v43 }
  0xb1   :  { %v90_v47 = vpop.permute.xlu1 %89 }
  0xb2   :  { %v96_v48 = vmul.f32 %v223_v44, %v90_v47  ;;  %v86_v49 = vadd.f32 %v85_v46, %v75_v45 }
  0xb4   :  { %v97_v51 = vadd.f32 %v96_v48, %v86_v49 }
  0xb6   :  { %v103_v52 = vadd.f32 %v224_v50, %v97_v51 }
  0xb8   :  { %322 = vtanh.f32 %v103_v52 }
  0xc2   :  { %v323_v53 = vpop.eup %322 }
  0xc3   :  { %278 = vmatmul.mubr.f32.vlgmr.msra.gmra.mrb[0].mxu0 %v323_v53 }
 0x196   :  { %v192_v55 = vpop.f32.mrb[0].mxu0 }
 0x197   :  { %v193_v56 = vadd.f32 %v225_v54, %v192_v55  ;;  %v279_v57 = vpop.f32.mrb[1].mxu0 }
 0x199   :  { %324 = vtanh.f32 %v193_v56 }
 0x1a3   :  { %v325_v59 = vpop.eup %324 }
 0x1a4   :  { %v202_v61 = vmul.f32 %v325_v59, %v226_v58 }
 0x1a6   :  { %v208_v62 = vadd.f32 %v227_v60, %v202_v61 }
 0x1a8   :  { %209 = vadd.xlane.f32.xlu0 %v208_v62 }
 0x235   :  { %v210_v63 = vpop.xlane.xlu0 %209 }
 0x236   :  { %212 = vst.msk [vmem:[%s439_s3] sm:$0xff] %vm211_vm1, %v210_v63 }
 0x237   :  { %217 = vsyncpa [#allocation3], 1 }
 0x238   :  { %218 = vsyncpa [#allocation5], 1 }

</bundles_post_ra>
